<compile_context>
chip_gen: v5e
topology: v5e:2x2
jax: 0.10.0
libtpu: 0.0.40
codegen_flags: <defaults>
</compile_context>

<pallas_src>
import jax
import jax.numpy as jnp
import numpy as np
from jax.experimental import pallas as pl
from jax.experimental.pallas import tpu as pltpu  # noqa: F401  (kept for TPU-specific tuning)

# ---- model dimensions (small T2FN/TFN-style config) -------------------------
B, T = 2, 8
D_TEXT, D_AUDIO, D_VIDEO = 32, 16, 16
D_ALL = D_TEXT + D_AUDIO + D_VIDEO                      # 64
TD = T * D_ALL                                          # 512 (time folded into K)
H_TEXT = H_AUDIO = H_VIDEO = 7                          # so (h+1) == 8
NT, NA, NV = H_TEXT + 1, H_AUDIO + 1, H_VIDEO + 1       # 8, 8, 8
F = NT * NA * NV                                        # 512 fused features
H_POST = 32
OUT_DIM = 1
LANES = 128                                             # lane-dense width

# Row offsets inside the packed parameter slab (all 8-aligned).
OFF_WSUB = 0                   # (TD, 128)   stacked subnet weights (1/T folded)
OFF_BSUB = OFF_WSUB + TD       # 512         bias row (1.0 in the "ones" cols)
OFF_W1 = OFF_BSUB + 8          # 520         (F, 128) post-fusion layer 1 (cols 0..31)
OFF_B1 = OFF_W1 + F            # 1032
OFF_W2 = OFF_B1 + 8            # 1040        (128, 128), rows 0..31 / col 0 real
OFF_B2 = OFF_W2 + LANES        # 1168
SLAB_ROWS = OFF_B2 + 8         # 1176


def _amio_kernel(x_ref, p_ref, sel_ref, out_ref):
    # ---- fused modality subnets ---------------------------------------------
    # mean-pool folded into the weights (x is (B, T*64), weights are T stacked
    # copies of wsub/T); [1;h] augmentation folded into a zero weight column +
    # bias 1.0 (ReLU(1)=1).  One unmasked MXU matmul, no sublane reduction.
    x = x_ref[...]                                          # (B, 512)
    wsub = p_ref[OFF_WSUB:OFF_WSUB + TD, :]                 # (512, 128)
    bsub = p_ref[OFF_BSUB:OFF_BSUB + 1, :]                  # (1, 128)
    h = jnp.maximum(
        jnp.dot(x, wsub, preferred_element_type=jnp.float32) + bsub, 0.0)
    # h[:, 0:8]=[1;h_t], h[:, 8:16]=[1;h_a], h[:, 16:24]=[1;h_v], rest 0.

    # ---- tensor fusion (flattened 3-way outer product) ----------------------
    # fused[b, i*64 + j*8 + k] = t1[b,i] * a1[b,j] * v1[b,k]
    # Built with three PRECOMPUTED 0/1 selection matmuls (MXU) + two VPU
    # multiplies: no iota generation, no lane slices/concats/reshapes.
    et = sel_ref[0 * LANES:1 * LANES, :]                    # (128, 512)
    ea = sel_ref[1 * LANES:2 * LANES, :]                    # (128, 512)
    ev = sel_ref[2 * LANES:3 * LANES, :]                    # (128, 512)
    fused = (jnp.dot(h, et, preferred_element_type=jnp.float32)
             * jnp.dot(h, ea, preferred_element_type=jnp.float32)
             * jnp.dot(h, ev, preferred_element_type=jnp.float32))   # (B, 512)

    # ---- post-fusion MLP -----------------------------------------------------
    w1 = p_ref[OFF_W1:OFF_W1 + F, :]                        # (512, 128) cols 0..31 real
    b1 = p_ref[OFF_B1:OFF_B1 + 1, :]                        # (1, 128)
    z = jnp.maximum(
        jnp.dot(fused, w1, preferred_element_type=jnp.float32) + b1, 0.0)   # (B, 128)

    w2 = p_ref[OFF_W2:OFF_W2 + LANES, :]                    # (128, 128) col 0 real
    b2 = p_ref[OFF_B2:OFF_B2 + 1, :]                        # (1, 128)   col 0 real
    # Lane-dense (B, 128) store; the wrapper slices column 0.
    out_ref[...] = jnp.dot(z, w2, preferred_element_type=jnp.float32) + b2


# ---- one-time (model-load) packing: NOT on the per-call path ----------------
def build_selection_matrices():
    """Three constant (128, 512) 0/1 selection matrices, stacked -> (384, 512)."""
    r = np.arange(LANES)[:, None]
    c = np.arange(F)[None, :]
    et = (r == c // (NA * NV)).astype(np.float32)           # selects t1[i]
    ea = (r == NT + (c // NV) % NA).astype(np.float32)      # selects a1[j]
    ev = (r == NT + NA + c % NV).astype(np.float32)         # selects v1[k]
    return jnp.asarray(np.concatenate([et, ea, ev], axis=0))


def pack_params(p, t_len):
    """Pack all weights/biases into one lane-dense (1176, 128) f32 slab."""
    f32 = np.float32
    inv_t = 1.0 / float(t_len)

    wsub = np.zeros((D_ALL, LANES), f32)
    wsub[0:D_TEXT, 1:NT] = np.asarray(p["wt"], f32) * inv_t
    wsub[D_TEXT:D_TEXT + D_AUDIO, NT + 1:NT + NA] = np.asarray(p["wa"], f32) * inv_t
    wsub[D_TEXT + D_AUDIO:D_ALL, NT + NA + 1:NT + NA + NV] = np.asarray(p["wv"], f32) * inv_t
    wsub_stacked = np.tile(wsub, (t_len, 1))                # (512, 128): time-sum fold

    bsub = np.zeros((8, LANES), f32)
    bsub[0, 0] = 1.0
    bsub[0, 1:NT] = np.asarray(p["bt"], f32).reshape(-1)
    bsub[0, NT] = 1.0
    bsub[0, NT + 1:NT + NA] = np.asarray(p["ba"], f32).reshape(-1)
    bsub[0, NT + NA] = 1.0
    bsub[0, NT + NA + 1:NT + NA + NV] = np.asarray(p["bv"], f32).reshape(-1)

    w1 = np.zeros((F, LANES), f32)
    w1[:, 0:H_POST] = np.asarray(p["w1"], f32)
    b1 = np.zeros((8, LANES), f32)
    b1[0, 0:H_POST] = np.asarray(p["b1"], f32).reshape(-1)

    w2 = np.zeros((LANES, LANES), f32)
    w2[0:H_POST, 0:OUT_DIM] = np.asarray(p["w2"], f32)
    b2 = np.zeros((8, LANES), f32)
    b2[0, 0:OUT_DIM] = np.asarray(p["b2"], f32).reshape(-1)

    slab = np.concatenate([wsub_stacked, bsub, w1, b1, w2, b2], axis=0)
    assert slab.shape == (SLAB_ROWS, LANES)
    return jnp.asarray(slab)


# ---- per-call forward --------------------------------------------------------
def amio_forward(text_x, audio_x, video_x, slab, sel):
    b = text_x.shape[0]
    x_cat = jnp.concatenate(
        [text_x.astype(jnp.float32),
         audio_x.astype(jnp.float32),
         video_x.astype(jnp.float32)], axis=-1)             # (B, T, 64)
    x_flat = x_cat.reshape(b, -1)                           # (B, T*64) lane-dense
    # NOTE(v7x/v6e): if B ever scales, add a leading batch grid axis marked
    # "parallel" (both TensorCores) and tile against the 64 MiB v7x VMEM.
    res = pl.pallas_call(
        _amio_kernel,
        out_shape=jax.ShapeDtypeStruct((b, LANES), jnp.float32),
    )(x_flat, slab, sel)                                    # whole arrays in VMEM, no grid
    return res[:, :OUT_DIM]


amio_forward_jit = jax.jit(amio_forward)


# ---- plain-JAX reference -----------------------------------------------------
def ref_forward(text_x, audio_x, video_x, p):
    def sub(x, w, b):
        return jnp.maximum(jnp.mean(x, axis=1) @ w + b, 0.0)

    h_t = sub(text_x, p["wt"], p["bt"])
    h_a = sub(audio_x, p["wa"], p["ba"])
    h_v = sub(video_x, p["wv"], p["bv"])
    ones = jnp.ones((h_t.shape[0], 1), jnp.float32)
    t1 = jnp.concatenate([ones, h_t], axis=1)
    a1 = jnp.concatenate([ones, h_a], axis=1)
    v1 = jnp.concatenate([ones, h_v], axis=1)
    fused = jnp.einsum("bi,bj,bk->bijk", t1, a1, v1).reshape(t1.shape[0], -1)
    z = jnp.maximum(fused @ p["w1"] + p["b1"], 0.0)
    return z @ p["w2"] + p["b2"]


def init_params(key):
    ks = jax.random.split(key, 8)
    u = lambda k, shape, scale: (jax.random.uniform(k, shape, jnp.float32) - 0.5) * 2 * scale
    return {
        "wt": u(ks[0], (D_TEXT, H_TEXT), 1.0 / jnp.sqrt(D_TEXT)),
        "bt": jnp.zeros((1, H_TEXT), jnp.float32),
        "wa": u(ks[1], (D_AUDIO, H_AUDIO), 1.0 / jnp.sqrt(D_AUDIO)),
        "ba": jnp.zeros((1, H_AUDIO), jnp.float32),
        "wv": u(ks[2], (D_VIDEO, H_VIDEO), 1.0 / jnp.sqrt(D_VIDEO)),
        "bv": jnp.zeros((1, H_VIDEO), jnp.float32),
        "w1": u(ks[3], (F, H_POST), 1.0 / jnp.sqrt(F)),
        "b1": u(ks[4], (1, H_POST), 1.0 / jnp.sqrt(F)),
        "w2": u(ks[5], (H_POST, OUT_DIM), 1.0 / jnp.sqrt(H_POST)),
        "b2": u(ks[6], (1, OUT_DIM), 1.0 / jnp.sqrt(H_POST)),
    }


if __name__ == "__main__":
    key = jax.random.PRNGKey(0)
    k_t, k_a, k_v, k_p = jax.random.split(key, 4)
    text_x = jax.random.normal(k_t, (B, T, D_TEXT), jnp.float32)
    audio_x = jax.random.normal(k_a, (B, T, D_AUDIO), jnp.float32)
    video_x = jax.random.normal(k_v, (B, T, D_VIDEO), jnp.float32)
    params = init_params(k_p)

    # Model-load-time packing (hoisted out of the per-call hot path).
    slab = pack_params(params, T)
    sel = build_selection_matrices()

    out = amio_forward_jit(text_x, audio_x, video_x, slab, sel)
    out = jax.block_until_ready(out)

    ref = ref_forward(text_x, audio_x, video_x, params)
    assert out.shape == (B, OUT_DIM)
    assert jnp.allclose(out, ref, rtol=1e-3, atol=1e-3), (out, ref)
    print("KERNEL_OK")
</pallas_src>

<mosaic_0001>
module attributes {stable_mosaic.version = 11 : i64} {
  func.func @_amio_kernel(%arg0: memref<2x512xf32, #tpu.memory_space<vmem>>, %arg1: memref<1176x128xf32, #tpu.memory_space<vmem>>, %arg2: memref<384x512xf32, #tpu.memory_space<vmem>>, %arg3: memref<2x128xf32, #tpu.memory_space<vmem>>) attributes {dimension_semantics = [], scalar_prefetch = 0 : i64, scratch_operands = 0 : i64, tpu.core_type = #tpu.core_type<tc>} {
    %c0 = arith.constant 0 : index
    %c0_0 = arith.constant 0 : index
    %0 = vector.load %arg0[%c0, %c0_0] : memref<2x512xf32, #tpu.memory_space<vmem>>, vector<2x512xf32>
    %c0_1 = arith.constant 0 : index
    %c0_2 = arith.constant 0 : index
    %1 = vector.load %arg1[%c0_1, %c0_2] : memref<1176x128xf32, #tpu.memory_space<vmem>>, vector<512x128xf32>
    %c512 = arith.constant 512 : index
    %c0_3 = arith.constant 0 : index
    %2 = vector.load %arg1[%c512, %c0_3] : memref<1176x128xf32, #tpu.memory_space<vmem>>, vector<1x128xf32>
    %cst = arith.constant dense<0.000000e+00> : vector<2x128xf32>
    %3 = tpu.matmul %0, %1, %cst {dimension_numbers = #tpu.dot_dimension_numbers<[1], [0], [0], [1], [0, 0, 1, 1], [], []>} : vector<2x512xf32>, vector<512x128xf32>, vector<2x128xf32> -> vector<2x128xf32>
    %4 = vector.broadcast %2 : vector<1x128xf32> to vector<2x128xf32>
    %5 = arith.addf %3, %4 : vector<2x128xf32>
    %cst_4 = arith.constant 0.000000e+00 : f32
    %6 = vector.broadcast %cst_4 : f32 to vector<2x128xf32>
    %7 = arith.maximumf %5, %6 : vector<2x128xf32>
    %c0_5 = arith.constant 0 : index
    %c0_6 = arith.constant 0 : index
    %8 = vector.load %arg2[%c0_5, %c0_6] : memref<384x512xf32, #tpu.memory_space<vmem>>, vector<128x512xf32>
    %c128 = arith.constant 128 : index
    %c0_7 = arith.constant 0 : index
    %9 = vector.load %arg2[%c128, %c0_7] : memref<384x512xf32, #tpu.memory_space<vmem>>, vector<128x512xf32>
    %c256 = arith.constant 256 : index
    %c0_8 = arith.constant 0 : index
    %10 = vector.load %arg2[%c256, %c0_8] : memref<384x512xf32, #tpu.memory_space<vmem>>, vector<128x512xf32>
    %cst_9 = arith.constant dense<0.000000e+00> : vector<2x512xf32>
    %11 = tpu.matmul %7, %8, %cst_9 {dimension_numbers = #tpu.dot_dimension_numbers<[1], [0], [0], [1], [0, 0, 1, 1], [], []>} : vector<2x128xf32>, vector<128x512xf32>, vector<2x512xf32> -> vector<2x512xf32>
    %cst_10 = arith.constant dense<0.000000e+00> : vector<2x512xf32>
    %12 = tpu.matmul %7, %9, %cst_10 {dimension_numbers = #tpu.dot_dimension_numbers<[1], [0], [0], [1], [0, 0, 1, 1], [], []>} : vector<2x128xf32>, vector<128x512xf32>, vector<2x512xf32> -> vector<2x512xf32>
    %13 = arith.mulf %11, %12 : vector<2x512xf32>
    %cst_11 = arith.constant dense<0.000000e+00> : vector<2x512xf32>
    %14 = tpu.matmul %7, %10, %cst_11 {dimension_numbers = #tpu.dot_dimension_numbers<[1], [0], [0], [1], [0, 0, 1, 1], [], []>} : vector<2x128xf32>, vector<128x512xf32>, vector<2x512xf32> -> vector<2x512xf32>
    %15 = arith.mulf %13, %14 : vector<2x512xf32>
    %c520 = arith.constant 520 : index
    %c0_12 = arith.constant 0 : index
    %16 = vector.load %arg1[%c520, %c0_12] : memref<1176x128xf32, #tpu.memory_space<vmem>>, vector<512x128xf32>
    %c1032 = arith.constant 1032 : index
    %c0_13 = arith.constant 0 : index
    %17 = vector.load %arg1[%c1032, %c0_13] : memref<1176x128xf32, #tpu.memory_space<vmem>>, vector<1x128xf32>
    %cst_14 = arith.constant dense<0.000000e+00> : vector<2x128xf32>
    %18 = tpu.matmul %15, %16, %cst_14 {dimension_numbers = #tpu.dot_dimension_numbers<[1], [0], [0], [1], [0, 0, 1, 1], [], []>} : vector<2x512xf32>, vector<512x128xf32>, vector<2x128xf32> -> vector<2x128xf32>
    %19 = vector.broadcast %17 : vector<1x128xf32> to vector<2x128xf32>
    %20 = arith.addf %18, %19 : vector<2x128xf32>
    %cst_15 = arith.constant 0.000000e+00 : f32
    %21 = vector.broadcast %cst_15 : f32 to vector<2x128xf32>
    %22 = arith.maximumf %20, %21 : vector<2x128xf32>
    %c1040 = arith.constant 1040 : index
    %c0_16 = arith.constant 0 : index
    %23 = vector.load %arg1[%c1040, %c0_16] : memref<1176x128xf32, #tpu.memory_space<vmem>>, vector<128x128xf32>
    %c1168 = arith.constant 1168 : index
    %c0_17 = arith.constant 0 : index
    %24 = vector.load %arg1[%c1168, %c0_17] : memref<1176x128xf32, #tpu.memory_space<vmem>>, vector<1x128xf32>
    %cst_18 = arith.constant dense<0.000000e+00> : vector<2x128xf32>
    %25 = tpu.matmul %22, %23, %cst_18 {dimension_numbers = #tpu.dot_dimension_numbers<[1], [0], [0], [1], [0, 0, 1, 1], [], []>} : vector<2x128xf32>, vector<128x128xf32>, vector<2x128xf32> -> vector<2x128xf32>
    %26 = vector.broadcast %24 : vector<1x128xf32> to vector<2x128xf32>
    %27 = arith.addf %25, %26 : vector<2x128xf32>
    %c0_19 = arith.constant 0 : index
    %c0_20 = arith.constant 0 : index
    %28 = vector.load %arg3[%c0_19, %c0_20] : memref<2x128xf32, #tpu.memory_space<vmem>>, vector<2x128xf32>
    tpu.vector_store %arg3[%c0_19, %c0_20], %27 {strides = array<i32>} : memref<2x128xf32, #tpu.memory_space<vmem>>, vector<2x128xf32>,
    return
  }
}

</mosaic_0001>

<bundles_post_ra>
// kernel: amio_forward.1
= control target key start
LH: loop header
LB: loop body
LE: loop exit
PB: predicated region body
PF: predicated region fallthrough
CT: control target
= control target key end

     0   :  { %8 = vsyncpa [#allocation3], 0  ;;  %s949_s0 = inlined_call_operand.vmem [shape: f32[2,512], index: 0, kind: input, shape index: {}]   ;;  %s950_s1 = inlined_call_operand.hbm [shape: f32[1176,128], index: 1, kind: input, shape index: {}]   ;;  %s951_s2 = inlined_call_operand.hbm [shape: f32[384,512], index: 2, kind: input, shape index: {}]   ;;  %s952_s3 = inlined_call_operand.vmem [shape: f32[2,128], index: 3, kind: output, shape index: {}]  }
   0x1   :  { %s16_s14 = sshll.u32 %s950_s1, 4  ;;  %s17_s14 = int_to_ptr.hbm [resolvable:$true] %s16_s14 }
   0x2   :  { %9 = vsyncpa [#allocation5], 0  ;;  %s897_s15 = smov [#allocation2]   ;;  %s29_s19 = sshll.u32 %s951_s2, 4  ;;  %s30_s19 = int_to_ptr.hbm [resolvable:$true] %s29_s19 }
   0x3   :  { %s18_s16 = sshll.u32 %s897_s15, 4  ;;  %s898_s20 = smov 128   ;;  %s19_s16 = int_to_ptr.vmem [resolvable:$true] %s18_s16 }
   0x4   :  { %s899_s21 = smov 8   ;;  %s900_s22 = smov [#allocation4]  }
   0x5   :  { %24 = dma.hbm_to_vmem [thread:$0]  %s17_s14, 18816, %s19_s16, [#allocation3], %s898_s20, %s898_s20, %s899_s21  }
   0x6   :  { %s31_s23 = sshll.u32 %s900_s22, 4  ;;  %s901_s24 = smov 512   ;;  %s32_s23 = int_to_ptr.vmem [resolvable:$true] %s31_s23 }
   0x7   :  { %s902_s25 = smov 32  }
   0x8   :  { %37 = dma.hbm_to_vmem [thread:$0]  %s30_s19, 24576, %s32_s23, [#allocation5], %s901_s24, %s901_s24, %s902_s25  }
   0x9   :  { %893 = dma.done.wait [#allocation3], 18816  }
   0xa   :  { %894 = vsyncadd [#allocation3], 4294948480 }
   0xb   :  { %895 = dma.done.wait [#allocation5], 24576  }
   0xc   :  { %896 = vsyncadd [#allocation5], 4294942720  ;;  %v94_v0 = vld [vmem:[#allocation2 + $0x178] sm:$0xff]  ;;  %v93_v2 = vld [vmem:[#allocation2 + $0x170] sm:$0xff] }
   0xd   :  { %v62_v1 = vld [vmem:[#allocation2 + $0x78] sm:$0xff]  ;;  %163 = vmatpush.msra.mxu2 %v94_v0  ;;  %v61_v4 = vld [vmem:[#allocation2 + $0x70] sm:$0xff]  ;;  %v92_v6 = vld [vmem:[#allocation2 + $0x168] sm:$0xff] }
   0xe   :  { %123 = vmatpush.msra.mxu0 %v62_v1  ;;  %v110_v3 = vld [vmem:[#allocation2 + $0x1f8] sm:$0xff]  ;;  %v109_v7 = vld [vmem:[#allocation2 + $0x1f0] sm:$0xff]  ;;  %v60_v8 = vld [vmem:[#allocation2 + $0x68] sm:$0xff] }
   0xf   :  { %v78_v5 = vld [vmem:[#allocation2 + $0xf8] sm:$0xff]  ;;  %183 = vmatpush.msra.mxu3 %v110_v3  ;;  %164 = vmatpush.msra.mxu2 %v93_v2  ;;  %v77_v9 = vld [vmem:[#allocation2 + $0xf0] sm:$0xff]  ;;  %v108_v10 = vld [vmem:[#allocation2 + $0x1e8] sm:$0xff] }
  0x10   :  { %143 = vmatpush.msra.mxu1 %v78_v5  ;;  %124 = vmatpush.msra.mxu0 %v61_v4  ;;  %v91_v11 = vld [vmem:[#allocation2 + $0x160] sm:$0xff]  ;;  %v76_v13 = vld [vmem:[#allocation2 + $0xe8] sm:$0xff]  ;;  %v90_v16 = vld [vmem:[#allocation2 + $0x158] sm:$0xff] }
  0x11   :  { %184 = vmatpush.msra.mxu3 %v109_v7  ;;  %v59_v12 = vld [vmem:[#allocation2 + $0x60] sm:$0xff]  ;;  %165 = vmatpush.msra.mxu2 %v92_v6  ;;  %v58_v17 = vld [vmem:[#allocation2 + $0x58] sm:$0xff]  ;;  %v89_v20 = vld [vmem:[#allocation2 + $0x150] sm:$0xff] }
  0x12   :  { %144 = vmatpush.msra.mxu1 %v77_v9  ;;  %125 = vmatpush.msra.mxu0 %v60_v8  ;;  %v107_v14 = vld [vmem:[#allocation2 + $0x1e0] sm:$0xff]  ;;  %v106_v18 = vld [vmem:[#allocation2 + $0x1d8] sm:$0xff]  ;;  %v57_v21 = vld [vmem:[#allocation2 + $0x50] sm:$0xff] }
  0x13   :  { %v75_v15 = vld [vmem:[#allocation2 + $0xe0] sm:$0xff]  ;;  %185 = vmatpush.msra.mxu3 %v108_v10  ;;  %166 = vmatpush.msra.mxu2 %v91_v11  ;;  %v74_v19 = vld [vmem:[#allocation2 + $0xd8] sm:$0xff]  ;;  %v105_v22 = vld [vmem:[#allocation2 + $0x1d0] sm:$0xff] }
  0x14   :  { %145 = vmatpush.msra.mxu1 %v76_v13  ;;  %126 = vmatpush.msra.mxu0 %v59_v12  ;;  %v73_v23 = vld [vmem:[#allocation2 + $0xd0] sm:$0xff]  ;;  %v88_v24 = vld [vmem:[#allocation2 + $0x148] sm:$0xff]  ;;  %v87_v28 = vld [vmem:[#allocation2 + $0x140] sm:$0xff] }
  0x15   :  { %186 = vmatpush.msra.mxu3 %v107_v14  ;;  %167 = vmatpush.msra.mxu2 %v90_v16  ;;  %v56_v25 = vld [vmem:[#allocation2 + $0x48] sm:$0xff]  ;;  %v55_v29 = vld [vmem:[#allocation2 + $0x40] sm:$0xff]  ;;  %v86_v32 = vld [vmem:[#allocation2 + $0x138] sm:$0xff] }
  0x16   :  { %146 = vmatpush.msra.mxu1 %v75_v15  ;;  %127 = vmatpush.msra.mxu0 %v58_v17  ;;  %v104_v26 = vld [vmem:[#allocation2 + $0x1c8] sm:$0xff]  ;;  %v103_v30 = vld [vmem:[#allocation2 + $0x1c0] sm:$0xff]  ;;  %v54_v33 = vld [vmem:[#allocation2 + $0x38] sm:$0xff] }
  0x17   :  { %187 = vmatpush.msra.mxu3 %v106_v18  ;;  %168 = vmatpush.msra.mxu2 %v89_v20  ;;  %v72_v27 = vld [vmem:[#allocation2 + $0xc8] sm:$0xff]  ;;  %v71_v31 = vld [vmem:[#allocation2 + $0xc0] sm:$0xff]  ;;  %v102_v34 = vld [vmem:[#allocation2 + $0x1b8] sm:$0xff] }
  0x18   :  { %147 = vmatpush.msra.mxu1 %v74_v19  ;;  %128 = vmatpush.msra.mxu0 %v57_v21  ;;  %v70_v35 = vld [vmem:[#allocation2 + $0xb8] sm:$0xff]  ;;  %v85_v36 = vld [vmem:[#allocation2 + $0x130] sm:$0xff]  ;;  %v84_v40 = vld [vmem:[#allocation2 + $0x128] sm:$0xff] }
  0x19   :  { %188 = vmatpush.msra.mxu3 %v105_v22  ;;  %169 = vmatpush.msra.mxu2 %v88_v24  ;;  %v53_v37 = vld [vmem:[#allocation2 + $0x30] sm:$0xff]  ;;  %v52_v41 = vld [vmem:[#allocation2 + $0x28] sm:$0xff]  ;;  %v83_v44 = vld [vmem:[#allocation2 + $0x120] sm:$0xff] }
  0x1a   :  { %148 = vmatpush.msra.mxu1 %v73_v23  ;;  %129 = vmatpush.msra.mxu0 %v56_v25  ;;  %v101_v38 = vld [vmem:[#allocation2 + $0x1b0] sm:$0xff]  ;;  %v100_v42 = vld [vmem:[#allocation2 + $0x1a8] sm:$0xff]  ;;  %v51_v45 = vld [vmem:[#allocation2 + $0x20] sm:$0xff] }
  0x1b   :  { %189 = vmatpush.msra.mxu3 %v104_v26  ;;  %170 = vmatpush.msra.mxu2 %v87_v28  ;;  %v69_v39 = vld [vmem:[#allocation2 + $0xb0] sm:$0xff]  ;;  %v68_v43 = vld [vmem:[#allocation2 + $0xa8] sm:$0xff]  ;;  %v46_v46 = vld [vmem:[%s949_s0] sm:$0xff] }
  0x1c   :  { %149 = vmatpush.msra.mxu1 %v72_v27  ;;  %130 = vmatpush.msra.mxu0 %v55_v29  ;;  %v99_v47 = vld [vmem:[#allocation2 + $0x1a0] sm:$0xff]  ;;  %114 = vst [vmem:[#allocation1] ss:$4 sm:$0xff] %v46_v46  ;;  %v82_v49 = vld [vmem:[#allocation2 + $0x118] sm:$0xff]  ;;  %v81_v53 = vld [vmem:[#allocation2 + $0x110] sm:$0xff] }
  0x1d   :  { %190 = vmatpush.msra.mxu3 %v103_v30  ;;  %171 = vmatpush.msra.mxu2 %v86_v32  ;;  %v67_v48 = vld [vmem:[#allocation2 + $0xa0] sm:$0xff]  ;;  %v50_v50 = vld [vmem:[#allocation2 + $0x18] sm:$0xff]  ;;  %v49_v54 = vld [vmem:[#allocation2 + $0x10] sm:$0xff] }
  0x1e   :  { %150 = vmatpush.msra.mxu1 %v71_v31  ;;  %131 = vmatpush.msra.mxu0 %v54_v33  ;;  %v98_v51 = vld [vmem:[#allocation2 + $0x198] sm:$0xff]  ;;  %v97_v55 = vld [vmem:[#allocation2 + $0x190] sm:$0xff]  ;;  %v80_v57 = vld [vmem:[#allocation2 + $0x108] sm:$0xff] }
  0x1f   :  { %191 = vmatpush.msra.mxu3 %v102_v34  ;;  %172 = vmatpush.msra.mxu2 %v85_v36  ;;  %v66_v52 = vld [vmem:[#allocation2 + $0x98] sm:$0xff]  ;;  %v65_v56 = vld [vmem:[#allocation2 + $0x90] sm:$0xff]  ;;  %v48_v58 = vld [vmem:[#allocation2 + $0x8] sm:$0xff] }
  0x20   :  { %151 = vmatpush.msra.mxu1 %v70_v35  ;;  %132 = vmatpush.msra.mxu0 %v53_v37  ;;  %v96_v59 = vld [vmem:[#allocation2 + $0x188] sm:$0xff]  ;;  %v79_v61 = vld [vmem:[#allocation2 + $0x100] sm:$0xff]  ;;  %v264_v4 = vld [vmem:[#allocation4 + $0x1e0] sm:$0xff] }
  0x21   :  { %192 = vmatpush.msra.mxu3 %v101_v38  ;;  %173 = vmatpush.msra.mxu2 %v84_v40  ;;  %v64_v60 = vld [vmem:[#allocation2 + $0x88] sm:$0xff]  ;;  %v47_v62 = vld [vmem:[#allocation2] sm:$0xff]  ;;  %v267_v8 = vld [vmem:[#allocation4 + $0x1f8] sm:$0xff] }
  0x22   :  { %152 = vmatpush.msra.mxu1 %v69_v39  ;;  %133 = vmatpush.msra.mxu0 %v52_v41  ;;  %v95_v0 = vld [vmem:[#allocation2 + $0x180] sm:$0xff]  ;;  %v266_v6 = vld [vmem:[#allocation4 + $0x1f0] sm:$0xff]  ;;  %v260_v9 = vld [vmem:[#allocation4 + $0x1c0] sm:$0xff] }
  0x23   :  { %193 = vmatpush.msra.mxu3 %v100_v42  ;;  %174 = vmatpush.msra.mxu2 %v83_v44  ;;  %v117_v63 = vld.sshfl [vmem:[#allocation1 + $0x10] sm:$0xff pattern:$0x73625140]  ;;  %v115_v1 = vld.sshfl [vmem:[#allocation1] sm:$0xff pattern:$0x73625140] }
  0x24   :  { %153 = vmatpush.msra.mxu1 %v68_v43  ;;  %134 = vmatpush.msra.mxu0 %v51_v45  ;;  %v118_v2 = vld.sshfl [vmem:[#allocation1 + $0x18] sm:$0xff pattern:$0x73625140]  ;;  %v63_v3 = vld [vmem:[#allocation2 + $0x80] sm:$0xff]  ;;  %v262_v10 = vld [vmem:[#allocation4 + $0x1d0] sm:$0xff] }
  0x25   :  { %194 = vmatpush.msra.mxu3 %v99_v47  ;;  %175 = vmatpush.msra.mxu2 %v82_v49  ;;  %v116_v5 = vld.sshfl [vmem:[#allocation1 + $0x8] sm:$0xff pattern:$0x73625140]  ;;  %v263_v12 = vld [vmem:[#allocation4 + $0x1d8] sm:$0xff]  ;;  %v256_v13 = vld [vmem:[#allocation4 + $0x1a0] sm:$0xff] }
  0x26   :  { %154 = vmatpush.msra.mxu1 %v67_v48  ;;  %135 = vmatpush.msra.mxu0 %v50_v50  ;;  %v265_v7 = vld [vmem:[#allocation4 + $0x1e8] sm:$0xff]  ;;  %v258_v14 = vld [vmem:[#allocation4 + $0x1b0] sm:$0xff]  ;;  %v259_v16 = vld [vmem:[#allocation4 + $0x1b8] sm:$0xff] }
  0x27   :  { %195 = vmatpush.msra.mxu3 %v98_v51  ;;  %176 = vmatpush.msra.mxu2 %v81_v53  ;;  %v261_v11 = vld [vmem:[#allocation4 + $0x1c8] sm:$0xff]  ;;  %v252_v17 = vld [vmem:[#allocation4 + $0x180] sm:$0xff]  ;;  %v254_v18 = vld [vmem:[#allocation4 + $0x190] sm:$0xff] }
  0x28   :  { %155 = vmatpush.msra.mxu1 %v66_v52  ;;  %136 = vmatpush.msra.mxu0 %v49_v54  ;;  %v257_v15 = vld [vmem:[#allocation4 + $0x1a8] sm:$0xff]  ;;  %v255_v20 = vld [vmem:[#allocation4 + $0x198] sm:$0xff]  ;;  %v248_v21 = vld [vmem:[#allocation4 + $0x160] sm:$0xff] }
  0x29   :  { %196 = vmatpush.msra.mxu3 %v97_v55  ;;  %177 = vmatpush.msra.mxu2 %v80_v57  ;;  %v253_v19 = vld [vmem:[#allocation4 + $0x188] sm:$0xff]  ;;  %v250_v22 = vld [vmem:[#allocation4 + $0x170] sm:$0xff]  ;;  %v251_v24 = vld [vmem:[#allocation4 + $0x178] sm:$0xff] }
  0x2a   :  { %156 = vmatpush.msra.mxu1 %v65_v56  ;;  %137 = vmatpush.msra.mxu0 %v48_v58  ;;  %v249_v23 = vld [vmem:[#allocation4 + $0x168] sm:$0xff]  ;;  %v244_v25 = vld [vmem:[#allocation4 + $0x140] sm:$0xff]  ;;  %v246_v26 = vld [vmem:[#allocation4 + $0x150] sm:$0xff] }
  0x2b   :  { %197 = vmatpush.msra.mxu3 %v96_v59  ;;  %178 = vmatpush.msra.mxu2 %v79_v61  ;;  %v245_v27 = vld [vmem:[#allocation4 + $0x148] sm:$0xff]  ;;  %v247_v28 = vld [vmem:[#allocation4 + $0x158] sm:$0xff]  ;;  %v240_v29 = vld [vmem:[#allocation4 + $0x120] sm:$0xff] }
  0x2c   :  { %157 = vmatpush.msra.mxu1 %v64_v60  ;;  %138 = vmatpush.msra.mxu0 %v47_v62  ;;  %v242_v30 = vld [vmem:[#allocation4 + $0x130] sm:$0xff]  ;;  %v241_v31 = vld [vmem:[#allocation4 + $0x128] sm:$0xff]  ;;  %v243_v32 = vld [vmem:[#allocation4 + $0x138] sm:$0xff] }
  0x2d   :  { %179 = vmatmul.f32.vlgmr.msra.gmra.mxu2 %v117_v63  ;;  %198 = vmatpush.msra.mxu3 %v95_v0  ;;  %v236_v33 = vld [vmem:[#allocation4 + $0x100] sm:$0xff]  ;;  %v238_v34 = vld [vmem:[#allocation4 + $0x110] sm:$0xff]  ;;  %v237_v35 = vld [vmem:[#allocation4 + $0x108] sm:$0xff] }
  0x2e   :  { %139 = vmatmul.f32.vlgmr.msra.gmra.mxu0 %v115_v1  ;;  %199 = vmatmul.f32.vlgmr.msra.gmra.mxu3 %v118_v2  ;;  %v239_v36 = vld [vmem:[#allocation4 + $0x118] sm:$0xff]  ;;  %v232_v37 = vld [vmem:[#allocation4 + $0xe0] sm:$0xff]  ;;  %v234_v38 = vld [vmem:[#allocation4 + $0xf0] sm:$0xff] }
  0x2f   :  { %158 = vmatpush.msra.mxu1 %v63_v3  ;;  %396 = vmatpush.msrb.mxu0 %v264_v4  ;;  %v233_v39 = vld [vmem:[#allocation4 + $0xe8] sm:$0xff]  ;;  %v235_v40 = vld [vmem:[#allocation4 + $0xf8] sm:$0xff]  ;;  %v228_v41 = vld [vmem:[#allocation4 + $0xc0] sm:$0xff] }
  0x30   :  { %159 = vmatmul.f32.vlgmr.msra.gmra.mxu1 %v116_v5  ;;  %436 = vmatpush.msrb.mxu2 %v266_v6  ;;  %v230_v42 = vld [vmem:[#allocation4 + $0xd0] sm:$0xff]  ;;  %v229_v43 = vld [vmem:[#allocation4 + $0xc8] sm:$0xff]  ;;  %v231_v44 = vld [vmem:[#allocation4 + $0xd8] sm:$0xff] }
  0x31   :  { %416 = vmatpush.msrb.mxu1 %v265_v7  ;;  %456 = vmatpush.msrb.mxu3 %v267_v8  ;;  %v224_v45 = vld [vmem:[#allocation4 + $0xa0] sm:$0xff]  ;;  %v226_v46 = vld [vmem:[#allocation4 + $0xb0] sm:$0xff]  ;;  %v225_v47 = vld [vmem:[#allocation4 + $0xa8] sm:$0xff] }
  0x32   :  { %397 = vmatpush.msrb.mxu0 %v260_v9  ;;  %437 = vmatpush.msrb.mxu2 %v262_v10  ;;  %v227_v48 = vld [vmem:[#allocation4 + $0xb8] sm:$0xff]  ;;  %v220_v49 = vld [vmem:[#allocation4 + $0x80] sm:$0xff]  ;;  %v222_v50 = vld [vmem:[#allocation4 + $0x90] sm:$0xff] }
  0x33   :  { %417 = vmatpush.msrb.mxu1 %v261_v11  ;;  %457 = vmatpush.msrb.mxu3 %v263_v12  ;;  %v221_v51 = vld [vmem:[#allocation4 + $0x88] sm:$0xff]  ;;  %v223_v52 = vld [vmem:[#allocation4 + $0x98] sm:$0xff]  ;;  %v216_v53 = vld [vmem:[#allocation4 + $0x60] sm:$0xff] }
  0x34   :  { %398 = vmatpush.msrb.mxu0 %v256_v13  ;;  %438 = vmatpush.msrb.mxu2 %v258_v14  ;;  %v218_v54 = vld [vmem:[#allocation4 + $0x70] sm:$0xff]  ;;  %v217_v55 = vld [vmem:[#allocation4 + $0x68] sm:$0xff]  ;;  %v219_v56 = vld [vmem:[#allocation4 + $0x78] sm:$0xff] }
  0x35   :  { %418 = vmatpush.msrb.mxu1 %v257_v15  ;;  %458 = vmatpush.msrb.mxu3 %v259_v16  ;;  %v212_v57 = vld [vmem:[#allocation4 + $0x40] sm:$0xff]  ;;  %v213_v58 = vld [vmem:[#allocation4 + $0x48] sm:$0xff]  ;;  %v214_v59 = vld [vmem:[#allocation4 + $0x50] sm:$0xff] }
  0x36   :  { %399 = vmatpush.msrb.mxu0 %v252_v17  ;;  %439 = vmatpush.msrb.mxu2 %v254_v18  ;;  %v215_v60 = vld [vmem:[#allocation4 + $0x58] sm:$0xff]  ;;  %v208_v61 = vld [vmem:[#allocation4 + $0x20] sm:$0xff]  ;;  %v210_v62 = vld [vmem:[#allocation4 + $0x30] sm:$0xff] }
  0x37   :  { %419 = vmatpush.msrb.mxu1 %v253_v19  ;;  %459 = vmatpush.msrb.mxu3 %v255_v20  ;;  %v209_v63 = vld [vmem:[#allocation4 + $0x28] sm:$0xff]  ;;  %v211_v0 = vld [vmem:[#allocation4 + $0x38] sm:$0xff]  ;;  %v204_v1 = vld [vmem:[#allocation4] sm:$0xff] }
  0x38   :  { %400 = vmatpush.msrb.mxu0 %v248_v21  ;;  %440 = vmatpush.msrb.mxu2 %v250_v22  ;;  %v206_v2 = vld [vmem:[#allocation4 + $0x10] sm:$0xff]  ;;  %v205_v3 = vld [vmem:[#allocation4 + $0x8] sm:$0xff]  ;;  %v207_v4 = vld [vmem:[#allocation4 + $0x18] sm:$0xff] }
  0x39   :  { %420 = vmatpush.msrb.mxu1 %v249_v23  ;;  %460 = vmatpush.msrb.mxu3 %v251_v24  ;;  %v328_v5 = vld [vmem:[#allocation4 + $0x3e0] sm:$0xff]  ;;  %v329_v6 = vld [vmem:[#allocation4 + $0x3e8] sm:$0xff]  ;;  %v330_v7 = vld [vmem:[#allocation4 + $0x3f0] sm:$0xff] }
  0x3a   :  { %401 = vmatpush.msrb.mxu0 %v244_v25  ;;  %441 = vmatpush.msrb.mxu2 %v246_v26  ;;  %v331_v8 = vld [vmem:[#allocation4 + $0x3f8] sm:$0xff]  ;;  %v324_v9 = vld [vmem:[#allocation4 + $0x3c0] sm:$0xff]  ;;  %v325_v10 = vld [vmem:[#allocation4 + $0x3c8] sm:$0xff] }
  0x3b   :  { %421 = vmatpush.msrb.mxu1 %v245_v27  ;;  %461 = vmatpush.msrb.mxu3 %v247_v28  ;;  %v326_v11 = vld [vmem:[#allocation4 + $0x3d0] sm:$0xff]  ;;  %v327_v12 = vld [vmem:[#allocation4 + $0x3d8] sm:$0xff]  ;;  %v320_v13 = vld [vmem:[#allocation4 + $0x3a0] sm:$0xff] }
  0x3c   :  { %402 = vmatpush.msrb.mxu0 %v240_v29  ;;  %442 = vmatpush.msrb.mxu2 %v242_v30  ;;  %v321_v14 = vld [vmem:[#allocation4 + $0x3a8] sm:$0xff]  ;;  %v322_v15 = vld [vmem:[#allocation4 + $0x3b0] sm:$0xff]  ;;  %v323_v16 = vld [vmem:[#allocation4 + $0x3b8] sm:$0xff] }
  0x3d   :  { %422 = vmatpush.msrb.mxu1 %v241_v31  ;;  %462 = vmatpush.msrb.mxu3 %v243_v32  ;;  %v316_v17 = vld [vmem:[#allocation4 + $0x380] sm:$0xff]  ;;  %v317_v18 = vld [vmem:[#allocation4 + $0x388] sm:$0xff]  ;;  %v318_v19 = vld [vmem:[#allocation4 + $0x390] sm:$0xff] }
  0x3e   :  { %403 = vmatpush.msrb.mxu0 %v236_v33  ;;  %443 = vmatpush.msrb.mxu2 %v238_v34  ;;  %v319_v20 = vld [vmem:[#allocation4 + $0x398] sm:$0xff]  ;;  %v312_v21 = vld [vmem:[#allocation4 + $0x360] sm:$0xff]  ;;  %v313_v22 = vld [vmem:[#allocation4 + $0x368] sm:$0xff] }
  0x3f   :  { %423 = vmatpush.msrb.mxu1 %v237_v35  ;;  %463 = vmatpush.msrb.mxu3 %v239_v36  ;;  %v314_v23 = vld [vmem:[#allocation4 + $0x370] sm:$0xff]  ;;  %v315_v24 = vld [vmem:[#allocation4 + $0x378] sm:$0xff]  ;;  %v308_v25 = vld [vmem:[#allocation4 + $0x340] sm:$0xff] }
  0x40   :  { %404 = vmatpush.msrb.mxu0 %v232_v37  ;;  %444 = vmatpush.msrb.mxu2 %v234_v38  ;;  %v309_v26 = vld [vmem:[#allocation4 + $0x348] sm:$0xff]  ;;  %v310_v27 = vld [vmem:[#allocation4 + $0x350] sm:$0xff]  ;;  %v311_v28 = vld [vmem:[#allocation4 + $0x358] sm:$0xff] }
  0x41   :  { %424 = vmatpush.msrb.mxu1 %v233_v39  ;;  %464 = vmatpush.msrb.mxu3 %v235_v40  ;;  %v304_v29 = vld [vmem:[#allocation4 + $0x320] sm:$0xff]  ;;  %v305_v30 = vld [vmem:[#allocation4 + $0x328] sm:$0xff]  ;;  %v306_v31 = vld [vmem:[#allocation4 + $0x330] sm:$0xff] }
  0x42   :  { %405 = vmatpush.msrb.mxu0 %v228_v41  ;;  %445 = vmatpush.msrb.mxu2 %v230_v42  ;;  %v307_v32 = vld [vmem:[#allocation4 + $0x338] sm:$0xff]  ;;  %v300_v33 = vld [vmem:[#allocation4 + $0x300] sm:$0xff]  ;;  %v301_v34 = vld [vmem:[#allocation4 + $0x308] sm:$0xff] }
  0x43   :  { %425 = vmatpush.msrb.mxu1 %v229_v43  ;;  %465 = vmatpush.msrb.mxu3 %v231_v44  ;;  %v302_v35 = vld [vmem:[#allocation4 + $0x310] sm:$0xff]  ;;  %v303_v36 = vld [vmem:[#allocation4 + $0x318] sm:$0xff]  ;;  %v296_v37 = vld [vmem:[#allocation4 + $0x2e0] sm:$0xff] }
  0x44   :  { %406 = vmatpush.msrb.mxu0 %v224_v45  ;;  %446 = vmatpush.msrb.mxu2 %v226_v46  ;;  %v297_v38 = vld [vmem:[#allocation4 + $0x2e8] sm:$0xff]  ;;  %v298_v39 = vld [vmem:[#allocation4 + $0x2f0] sm:$0xff]  ;;  %v299_v40 = vld [vmem:[#allocation4 + $0x2f8] sm:$0xff] }
  0x45   :  { %426 = vmatpush.msrb.mxu1 %v225_v47  ;;  %466 = vmatpush.msrb.mxu3 %v227_v48  ;;  %v292_v41 = vld [vmem:[#allocation4 + $0x2c0] sm:$0xff]  ;;  %v293_v42 = vld [vmem:[#allocation4 + $0x2c8] sm:$0xff]  ;;  %v294_v43 = vld [vmem:[#allocation4 + $0x2d0] sm:$0xff] }
  0x46   :  { %407 = vmatpush.msrb.mxu0 %v220_v49  ;;  %447 = vmatpush.msrb.mxu2 %v222_v50  ;;  %v295_v44 = vld [vmem:[#allocation4 + $0x2d8] sm:$0xff]  ;;  %v288_v45 = vld [vmem:[#allocation4 + $0x2a0] sm:$0xff]  ;;  %v289_v46 = vld [vmem:[#allocation4 + $0x2a8] sm:$0xff] }
  0x47   :  { %427 = vmatpush.msrb.mxu1 %v221_v51  ;;  %467 = vmatpush.msrb.mxu3 %v223_v52  ;;  %v290_v47 = vld [vmem:[#allocation4 + $0x2b0] sm:$0xff]  ;;  %v291_v48 = vld [vmem:[#allocation4 + $0x2b8] sm:$0xff]  ;;  %v284_v49 = vld [vmem:[#allocation4 + $0x280] sm:$0xff] }
  0x48   :  { %408 = vmatpush.msrb.mxu0 %v216_v53  ;;  %448 = vmatpush.msrb.mxu2 %v218_v54  ;;  %v285_v50 = vld [vmem:[#allocation4 + $0x288] sm:$0xff]  ;;  %v286_v51 = vld [vmem:[#allocation4 + $0x290] sm:$0xff]  ;;  %v287_v52 = vld [vmem:[#allocation4 + $0x298] sm:$0xff] }
  0x49   :  { %428 = vmatpush.msrb.mxu1 %v217_v55  ;;  %468 = vmatpush.msrb.mxu3 %v219_v56  ;;  %v280_v53 = vld [vmem:[#allocation4 + $0x260] sm:$0xff]  ;;  %v281_v54 = vld [vmem:[#allocation4 + $0x268] sm:$0xff]  ;;  %v282_v55 = vld [vmem:[#allocation4 + $0x270] sm:$0xff] }
  0x4a   :  { %409 = vmatpush.msrb.mxu0 %v212_v57  ;;  %449 = vmatpush.msrb.mxu2 %v214_v59  ;;  %v283_v56 = vld [vmem:[#allocation4 + $0x278] sm:$0xff]  ;;  %v276_v57 = vld [vmem:[#allocation4 + $0x240] sm:$0xff]  ;;  %v278_v59 = vld [vmem:[#allocation4 + $0x250] sm:$0xff] }
  0x4b   :  { %429 = vmatpush.msrb.mxu1 %v213_v58  ;;  %469 = vmatpush.msrb.mxu3 %v215_v60  ;;  %v277_v58 = vld [vmem:[#allocation4 + $0x248] sm:$0xff]  ;;  %v279_v60 = vld [vmem:[#allocation4 + $0x258] sm:$0xff] }
  0x4c   :  { %410 = vmatpush.msrb.mxu0 %v208_v61  ;;  %450 = vmatpush.msrb.mxu2 %v210_v62  ;;  %v272_v61 = vld [vmem:[#allocation4 + $0x220] sm:$0xff]  ;;  %v273_v62 = vld [vmem:[#allocation4 + $0x228] sm:$0xff] }
  0x4d   :  { %430 = vmatpush.msrb.mxu1 %v209_v63  ;;  %470 = vmatpush.msrb.mxu3 %v211_v0  ;;  %v274_v63 = vld [vmem:[#allocation4 + $0x230] sm:$0xff]  ;;  %v275_v0 = vld [vmem:[#allocation4 + $0x238] sm:$0xff] }
  0x4e   :  { %411 = vmatpush.msrb.mxu0 %v204_v1  ;;  %451 = vmatpush.msrb.mxu2 %v206_v2  ;;  %v268_v1 = vld [vmem:[#allocation4 + $0x200] sm:$0xff]  ;;  %v269_v2 = vld [vmem:[#allocation4 + $0x208] sm:$0xff] }
  0x4f   :  { %431 = vmatpush.msrb.mxu1 %v205_v3  ;;  %471 = vmatpush.msrb.mxu3 %v207_v4  ;;  %v270_v3 = vld [vmem:[#allocation4 + $0x210] sm:$0xff]  ;;  %v271_v4 = vld [vmem:[#allocation4 + $0x218] sm:$0xff] }
  0x50   :  { %476 = vmatpush.msra.mxu0 %v328_v5  ;;  %516 = vmatpush.msra.mxu2 %v330_v7  ;;  %v842_v5 = vld [vmem:[#allocation2 + $0x200] ss:$0 sm:$0xff] }
  0x51   :  { %496 = vmatpush.msra.mxu1 %v329_v6  ;;  %536 = vmatpush.msra.mxu3 %v331_v8 }
  0x52   :  { %477 = vmatpush.msra.mxu0 %v324_v9  ;;  %517 = vmatpush.msra.mxu2 %v326_v11 }
  0x53   :  { %497 = vmatpush.msra.mxu1 %v325_v10  ;;  %537 = vmatpush.msra.mxu3 %v327_v12 }
  0x54   :  { %478 = vmatpush.msra.mxu0 %v320_v13  ;;  %518 = vmatpush.msra.mxu2 %v322_v15  ;;  %v392_v15 = vld [vmem:[#allocation4 + $0x5e0] sm:$0xff] }
  0x55   :  { %498 = vmatpush.msra.mxu1 %v321_v14  ;;  %538 = vmatpush.msra.mxu3 %v323_v16  ;;  %v393_v16 = vld [vmem:[#allocation4 + $0x5e8] sm:$0xff] }
  0x56   :  { %479 = vmatpush.msra.mxu0 %v316_v17  ;;  %519 = vmatpush.msra.mxu2 %v318_v19  ;;  %v394_v17 = vld [vmem:[#allocation4 + $0x5f0] sm:$0xff]  ;;  %v388_v19 = vld [vmem:[#allocation4 + $0x5c0] sm:$0xff] }
  0x57   :  { %499 = vmatpush.msra.mxu1 %v317_v18  ;;  %539 = vmatpush.msra.mxu3 %v319_v20  ;;  %v395_v18 = vld [vmem:[#allocation4 + $0x5f8] sm:$0xff]  ;;  %v389_v20 = vld [vmem:[#allocation4 + $0x5c8] sm:$0xff] }
  0x58   :  { %480 = vmatpush.msra.mxu0 %v312_v21  ;;  %520 = vmatpush.msra.mxu2 %v314_v23  ;;  %v390_v21 = vld [vmem:[#allocation4 + $0x5d0] sm:$0xff]  ;;  %v384_v23 = vld [vmem:[#allocation4 + $0x5a0] sm:$0xff] }
  0x59   :  { %500 = vmatpush.msra.mxu1 %v313_v22  ;;  %540 = vmatpush.msra.mxu3 %v315_v24  ;;  %v391_v22 = vld [vmem:[#allocation4 + $0x5d8] sm:$0xff]  ;;  %v385_v24 = vld [vmem:[#allocation4 + $0x5a8] sm:$0xff] }
  0x5a   :  { %481 = vmatpush.msra.mxu0 %v308_v25  ;;  %521 = vmatpush.msra.mxu2 %v310_v27  ;;  %v386_v25 = vld [vmem:[#allocation4 + $0x5b0] sm:$0xff]  ;;  %v380_v27 = vld [vmem:[#allocation4 + $0x580] sm:$0xff] }
  0x5b   :  { %501 = vmatpush.msra.mxu1 %v309_v26  ;;  %541 = vmatpush.msra.mxu3 %v311_v28  ;;  %v387_v26 = vld [vmem:[#allocation4 + $0x5b8] sm:$0xff]  ;;  %v381_v28 = vld [vmem:[#allocation4 + $0x588] sm:$0xff] }
  0x5c   :  { %482 = vmatpush.msra.mxu0 %v304_v29  ;;  %522 = vmatpush.msra.mxu2 %v306_v31  ;;  %v382_v29 = vld [vmem:[#allocation4 + $0x590] sm:$0xff]  ;;  %v376_v31 = vld [vmem:[#allocation4 + $0x560] sm:$0xff] }
  0x5d   :  { %502 = vmatpush.msra.mxu1 %v305_v30  ;;  %542 = vmatpush.msra.mxu3 %v307_v32  ;;  %v383_v30 = vld [vmem:[#allocation4 + $0x598] sm:$0xff]  ;;  %v377_v32 = vld [vmem:[#allocation4 + $0x568] sm:$0xff] }
  0x5e   :  { %483 = vmatpush.msra.mxu0 %v300_v33  ;;  %523 = vmatpush.msra.mxu2 %v302_v35  ;;  %v378_v33 = vld [vmem:[#allocation4 + $0x570] sm:$0xff]  ;;  %v372_v35 = vld [vmem:[#allocation4 + $0x540] sm:$0xff] }
  0x5f   :  { %503 = vmatpush.msra.mxu1 %v301_v34  ;;  %543 = vmatpush.msra.mxu3 %v303_v36  ;;  %v379_v34 = vld [vmem:[#allocation4 + $0x578] sm:$0xff]  ;;  %v373_v36 = vld [vmem:[#allocation4 + $0x548] sm:$0xff] }
  0x60   :  { %484 = vmatpush.msra.mxu0 %v296_v37  ;;  %524 = vmatpush.msra.mxu2 %v298_v39  ;;  %v374_v37 = vld [vmem:[#allocation4 + $0x550] sm:$0xff]  ;;  %v368_v39 = vld [vmem:[#allocation4 + $0x520] sm:$0xff] }
  0x61   :  { %504 = vmatpush.msra.mxu1 %v297_v38  ;;  %544 = vmatpush.msra.mxu3 %v299_v40  ;;  %v375_v38 = vld [vmem:[#allocation4 + $0x558] sm:$0xff]  ;;  %v369_v40 = vld [vmem:[#allocation4 + $0x528] sm:$0xff] }
  0x62   :  { %485 = vmatpush.msra.mxu0 %v292_v41  ;;  %525 = vmatpush.msra.mxu2 %v294_v43  ;;  %v370_v41 = vld [vmem:[#allocation4 + $0x530] sm:$0xff]  ;;  %v364_v43 = vld [vmem:[#allocation4 + $0x500] sm:$0xff] }
  0x63   :  { %505 = vmatpush.msra.mxu1 %v293_v42  ;;  %545 = vmatpush.msra.mxu3 %v295_v44  ;;  %v371_v42 = vld [vmem:[#allocation4 + $0x538] sm:$0xff]  ;;  %v365_v44 = vld [vmem:[#allocation4 + $0x508] sm:$0xff] }
  0x64   :  { %486 = vmatpush.msra.mxu0 %v288_v45  ;;  %526 = vmatpush.msra.mxu2 %v290_v47  ;;  %v366_v45 = vld [vmem:[#allocation4 + $0x510] sm:$0xff]  ;;  %v360_v47 = vld [vmem:[#allocation4 + $0x4e0] sm:$0xff] }
  0x65   :  { %506 = vmatpush.msra.mxu1 %v289_v46  ;;  %546 = vmatpush.msra.mxu3 %v291_v48  ;;  %v367_v46 = vld [vmem:[#allocation4 + $0x518] sm:$0xff]  ;;  %v361_v48 = vld [vmem:[#allocation4 + $0x4e8] sm:$0xff] }
  0x66   :  { %487 = vmatpush.msra.mxu0 %v284_v49  ;;  %527 = vmatpush.msra.mxu2 %v286_v51  ;;  %v362_v49 = vld [vmem:[#allocation4 + $0x4f0] sm:$0xff]  ;;  %v356_v51 = vld [vmem:[#allocation4 + $0x4c0] sm:$0xff] }
  0x67   :  { %507 = vmatpush.msra.mxu1 %v285_v50  ;;  %547 = vmatpush.msra.mxu3 %v287_v52  ;;  %v363_v50 = vld [vmem:[#allocation4 + $0x4f8] sm:$0xff]  ;;  %v357_v52 = vld [vmem:[#allocation4 + $0x4c8] sm:$0xff] }
  0x68   :  { %488 = vmatpush.msra.mxu0 %v280_v53  ;;  %528 = vmatpush.msra.mxu2 %v282_v55  ;;  %v358_v53 = vld [vmem:[#allocation4 + $0x4d0] sm:$0xff]  ;;  %v352_v55 = vld [vmem:[#allocation4 + $0x4a0] sm:$0xff] }
  0x69   :  { %508 = vmatpush.msra.mxu1 %v281_v54  ;;  %548 = vmatpush.msra.mxu3 %v283_v56  ;;  %v359_v54 = vld [vmem:[#allocation4 + $0x4d8] sm:$0xff]  ;;  %v353_v56 = vld [vmem:[#allocation4 + $0x4a8] sm:$0xff] }
  0x6a   :  { %489 = vmatpush.msra.mxu0 %v276_v57  ;;  %529 = vmatpush.msra.mxu2 %v278_v59  ;;  %v354_v57 = vld [vmem:[#allocation4 + $0x4b0] sm:$0xff]  ;;  %v348_v59 = vld [vmem:[#allocation4 + $0x480] sm:$0xff] }
  0x6b   :  { %509 = vmatpush.msra.mxu1 %v277_v58  ;;  %549 = vmatpush.msra.mxu3 %v279_v60  ;;  %v355_v58 = vld [vmem:[#allocation4 + $0x4b8] sm:$0xff]  ;;  %v349_v60 = vld [vmem:[#allocation4 + $0x488] sm:$0xff] }
  0x6c   :  { %490 = vmatpush.msra.mxu0 %v272_v61  ;;  %530 = vmatpush.msra.mxu2 %v274_v63  ;;  %v350_v61 = vld [vmem:[#allocation4 + $0x490] sm:$0xff]  ;;  %v344_v63 = vld [vmem:[#allocation4 + $0x460] sm:$0xff] }
  0x6d   :  { %510 = vmatpush.msra.mxu1 %v273_v62  ;;  %550 = vmatpush.msra.mxu3 %v275_v0  ;;  %v351_v62 = vld [vmem:[#allocation4 + $0x498] sm:$0xff]  ;;  %v345_v0 = vld [vmem:[#allocation4 + $0x468] sm:$0xff] }
  0x6e   :  { %491 = vmatpush.msra.mxu0 %v268_v1  ;;  %531 = vmatpush.msra.mxu2 %v270_v3  ;;  %v346_v1 = vld [vmem:[#allocation4 + $0x470] sm:$0xff]  ;;  %v340_v3 = vld [vmem:[#allocation4 + $0x440] sm:$0xff] }
  0x6f   :  { %511 = vmatpush.msra.mxu1 %v269_v2  ;;  %551 = vmatpush.msra.mxu3 %v271_v4  ;;  %v347_v2 = vld [vmem:[#allocation4 + $0x478] sm:$0xff]  ;;  %v341_v4 = vld [vmem:[#allocation4 + $0x448] sm:$0xff] }
  0xab   :  { %v140_v6 = vpop.f32.mrf.mxu0 }
  0xac   :  { %v141_v7 = vadd.f32 %v842_v5, %v140_v6  ;;  %v342_v5 = vld [vmem:[#allocation4 + $0x450] sm:$0xff]  ;;  %v343_v6 = vld [vmem:[#allocation4 + $0x458] sm:$0xff] }
  0xad   :  { %v160_v8 = vpop.f32.mrf.mxu1 }
  0xae   :  { %v161_v9 = vadd.f32 %v160_v8, %v141_v7  ;;  %v336_v7 = vld [vmem:[#allocation4 + $0x420] sm:$0xff]  ;;  %v337_v8 = vld [vmem:[#allocation4 + $0x428] sm:$0xff] }
  0xb0   :  { %v180_v10 = vpop.f32.mrf.mxu2 }
  0xb1   :  { %v181_v11 = vadd.f32 %v180_v10, %v161_v9  ;;  %v200_v12 = vpop.f32.mrf.mxu3  ;;  %v338_v9 = vld [vmem:[#allocation4 + $0x430] sm:$0xff]  ;;  %v339_v10 = vld [vmem:[#allocation4 + $0x438] sm:$0xff] }
  0xb3   :  { %v201_v13 = vadd.f32 %v200_v12, %v181_v11  ;;  %v332_v11 = vld [vmem:[#allocation4 + $0x400] sm:$0xff]  ;;  %v333_v12 = vld [vmem:[#allocation4 + $0x408] sm:$0xff] }
  0xb5   :  { %v932_v14 = vmax.f32 %v201_v13, 0.0  ;;  %v334_v13 = vld [vmem:[#allocation4 + $0x410] sm:$0xff] }
  0xb7   :  { %412 = vmatmul.f32.vlgmr.msrb.gmra.mxu0 %v932_v14  ;;  %432 = vmatmul.f32.vlgmr.msrb.gmra.mxu1 %v932_v14 }
  0xb8   :  { %452 = vmatmul.f32.vlgmr.msrb.gmra.mxu2 %v932_v14  ;;  %472 = vmatmul.f32.vlgmr.msrb.gmra.mxu3 %v932_v14 }
  0xb9   :  { %560 = vmatpush.msrb.mxu0 %v392_v15  ;;  %580 = vmatpush.msrb.mxu1 %v393_v16  ;;  %v335_v15 = vld [vmem:[#allocation4 + $0x418] sm:$0xff]  ;;  %v659_v16 = vld [vmem:[#allocation2 + $0x280] sm:$0xff] }
  0xba   :  { %600 = vmatpush.msrb.mxu2 %v394_v17  ;;  %620 = vmatpush.msrb.mxu3 %v395_v18  ;;  %v675_v17 = vld [vmem:[#allocation2 + $0x300] sm:$0xff]  ;;  %v658_v18 = vld [vmem:[#allocation2 + $0x278] sm:$0xff] }
  0xbb   :  { %561 = vmatpush.msrb.mxu0 %v388_v19  ;;  %581 = vmatpush.msrb.mxu1 %v389_v20  ;;  %v674_v19 = vld [vmem:[#allocation2 + $0x2f8] sm:$0xff]  ;;  %v657_v20 = vld [vmem:[#allocation2 + $0x270] sm:$0xff] }
  0xbc   :  { %601 = vmatpush.msrb.mxu2 %v390_v21  ;;  %621 = vmatpush.msrb.mxu3 %v391_v22  ;;  %v673_v21 = vld [vmem:[#allocation2 + $0x2f0] sm:$0xff]  ;;  %v656_v22 = vld [vmem:[#allocation2 + $0x268] sm:$0xff] }
  0xbd   :  { %562 = vmatpush.msrb.mxu0 %v384_v23  ;;  %582 = vmatpush.msrb.mxu1 %v385_v24  ;;  %v672_v23 = vld [vmem:[#allocation2 + $0x2e8] sm:$0xff]  ;;  %v691_v24 = vld [vmem:[#allocation2 + $0x380] sm:$0xff] }
  0xbe   :  { %602 = vmatpush.msrb.mxu2 %v386_v25  ;;  %622 = vmatpush.msrb.mxu3 %v387_v26  ;;  %v707_v25 = vld [vmem:[#allocation2 + $0x400] sm:$0xff] }
  0xbf   :  { %563 = vmatpush.msrb.mxu0 %v380_v27  ;;  %583 = vmatpush.msrb.mxu1 %v381_v28  ;;  %v655_v26 = vld [vmem:[#allocation2 + $0x260] sm:$0xff]  ;;  %v690_v27 = vld [vmem:[#allocation2 + $0x378] sm:$0xff] }
  0xc0   :  { %603 = vmatpush.msrb.mxu2 %v382_v29  ;;  %623 = vmatpush.msrb.mxu3 %v383_v30  ;;  %v706_v28 = vld [vmem:[#allocation2 + $0x3f8] sm:$0xff] }
  0xc1   :  { %492 = vmatmul.f32.vlgmr.msra.gmra.mxu0 %v932_v14  ;;  %512 = vmatmul.f32.vlgmr.msra.gmra.mxu1 %v932_v14  ;;  %v654_v29 = vld [vmem:[#allocation2 + $0x258] sm:$0xff] }
  0xc2   :  { %532 = vmatmul.f32.vlgmr.msra.gmra.mxu2 %v932_v14  ;;  %552 = vmatmul.f32.vlgmr.msra.gmra.mxu3 %v932_v14  ;;  %v670_v30 = vld [vmem:[#allocation2 + $0x2d8] sm:$0xff] }
  0xc3   :  { %564 = vmatpush.msrb.mxu0 %v376_v31  ;;  %584 = vmatpush.msrb.mxu1 %v377_v32  ;;  %v689_v31 = vld [vmem:[#allocation2 + $0x370] sm:$0xff] }
  0xc4   :  { %604 = vmatpush.msrb.mxu2 %v378_v33  ;;  %624 = vmatpush.msrb.mxu3 %v379_v34  ;;  %v705_v32 = vld [vmem:[#allocation2 + $0x3f0] sm:$0xff] }
  0xc5   :  { %565 = vmatpush.msrb.mxu0 %v372_v35  ;;  %585 = vmatpush.msrb.mxu1 %v373_v36  ;;  %v653_v33 = vld [vmem:[#allocation2 + $0x250] sm:$0xff]  ;;  %v688_v35 = vld [vmem:[#allocation2 + $0x368] sm:$0xff] }
  0xc6   :  { %605 = vmatpush.msrb.mxu2 %v374_v37  ;;  %625 = vmatpush.msrb.mxu3 %v375_v38  ;;  %v669_v34 = vld [vmem:[#allocation2 + $0x2d0] sm:$0xff]  ;;  %v704_v36 = vld [vmem:[#allocation2 + $0x3e8] sm:$0xff] }
  0xc7   :  { %566 = vmatpush.msrb.mxu0 %v368_v39  ;;  %586 = vmatpush.msrb.mxu1 %v369_v40  ;;  %v652_v37 = vld [vmem:[#allocation2 + $0x248] sm:$0xff]  ;;  %v687_v39 = vld [vmem:[#allocation2 + $0x360] sm:$0xff] }
  0xc8   :  { %606 = vmatpush.msrb.mxu2 %v370_v41  ;;  %626 = vmatpush.msrb.mxu3 %v371_v42  ;;  %v668_v38 = vld [vmem:[#allocation2 + $0x2c8] sm:$0xff]  ;;  %v703_v40 = vld [vmem:[#allocation2 + $0x3e0] sm:$0xff] }
  0xc9   :  { %567 = vmatpush.msrb.mxu0 %v364_v43  ;;  %587 = vmatpush.msrb.mxu1 %v365_v44  ;;  %v651_v41 = vld [vmem:[#allocation2 + $0x240] sm:$0xff]  ;;  %v686_v43 = vld [vmem:[#allocation2 + $0x358] sm:$0xff] }
  0xca   :  { %607 = vmatpush.msrb.mxu2 %v366_v45  ;;  %627 = vmatpush.msrb.mxu3 %v367_v46  ;;  %v667_v42 = vld [vmem:[#allocation2 + $0x2c0] sm:$0xff]  ;;  %v702_v44 = vld [vmem:[#allocation2 + $0x3d8] sm:$0xff] }
  0xcb   :  { %568 = vmatpush.msrb.mxu0 %v360_v47  ;;  %588 = vmatpush.msrb.mxu1 %v361_v48  ;;  %v650_v45 = vld [vmem:[#allocation2 + $0x238] sm:$0xff]  ;;  %v685_v47 = vld [vmem:[#allocation2 + $0x350] sm:$0xff] }
  0xcc   :  { %608 = vmatpush.msrb.mxu2 %v362_v49  ;;  %628 = vmatpush.msrb.mxu3 %v363_v50  ;;  %v666_v46 = vld [vmem:[#allocation2 + $0x2b8] sm:$0xff]  ;;  %v701_v48 = vld [vmem:[#allocation2 + $0x3d0] sm:$0xff] }
  0xcd   :  { %569 = vmatpush.msrb.mxu0 %v356_v51  ;;  %589 = vmatpush.msrb.mxu1 %v357_v52  ;;  %v649_v49 = vld [vmem:[#allocation2 + $0x230] sm:$0xff]  ;;  %v684_v51 = vld [vmem:[#allocation2 + $0x348] sm:$0xff] }
  0xce   :  { %609 = vmatpush.msrb.mxu2 %v358_v53  ;;  %629 = vmatpush.msrb.mxu3 %v359_v54  ;;  %v665_v50 = vld [vmem:[#allocation2 + $0x2b0] sm:$0xff]  ;;  %v700_v52 = vld [vmem:[#allocation2 + $0x3c8] sm:$0xff] }
  0xcf   :  { %570 = vmatpush.msrb.mxu0 %v352_v55  ;;  %590 = vmatpush.msrb.mxu1 %v353_v56  ;;  %v648_v53 = vld [vmem:[#allocation2 + $0x228] sm:$0xff]  ;;  %v683_v55 = vld [vmem:[#allocation2 + $0x340] sm:$0xff] }
  0xd0   :  { %610 = vmatpush.msrb.mxu2 %v354_v57  ;;  %630 = vmatpush.msrb.mxu3 %v355_v58  ;;  %v664_v54 = vld [vmem:[#allocation2 + $0x2a8] sm:$0xff]  ;;  %v699_v56 = vld [vmem:[#allocation2 + $0x3c0] sm:$0xff] }
  0xd1   :  { %571 = vmatpush.msrb.mxu0 %v348_v59  ;;  %591 = vmatpush.msrb.mxu1 %v349_v60  ;;  %v647_v57 = vld [vmem:[#allocation2 + $0x220] sm:$0xff]  ;;  %v682_v59 = vld [vmem:[#allocation2 + $0x338] sm:$0xff] }
  0xd2   :  { %611 = vmatpush.msrb.mxu2 %v350_v61  ;;  %631 = vmatpush.msrb.mxu3 %v351_v62  ;;  %v663_v58 = vld [vmem:[#allocation2 + $0x2a0] sm:$0xff]  ;;  %v698_v60 = vld [vmem:[#allocation2 + $0x3b8] sm:$0xff] }
  0xd3   :  { %572 = vmatpush.msrb.mxu0 %v344_v63  ;;  %592 = vmatpush.msrb.mxu1 %v345_v0  ;;  %v646_v61 = vld [vmem:[#allocation2 + $0x218] sm:$0xff]  ;;  %v681_v63 = vld [vmem:[#allocation2 + $0x330] sm:$0xff] }
  0xd4   :  { %612 = vmatpush.msrb.mxu2 %v346_v1  ;;  %632 = vmatpush.msrb.mxu3 %v347_v2  ;;  %v662_v62 = vld [vmem:[#allocation2 + $0x298] sm:$0xff]  ;;  %v697_v0 = vld [vmem:[#allocation2 + $0x3b0] sm:$0xff] }
  0xd5   :  { %573 = vmatpush.msrb.mxu0 %v340_v3  ;;  %593 = vmatpush.msrb.mxu1 %v341_v4  ;;  %v645_v1 = vld [vmem:[#allocation2 + $0x210] sm:$0xff]  ;;  %v680_v3 = vld [vmem:[#allocation2 + $0x328] sm:$0xff] }
  0xd6   :  { %613 = vmatpush.msrb.mxu2 %v342_v5  ;;  %633 = vmatpush.msrb.mxu3 %v343_v6  ;;  %v661_v2 = vld [vmem:[#allocation2 + $0x290] sm:$0xff]  ;;  %v696_v4 = vld [vmem:[#allocation2 + $0x3a8] sm:$0xff] }
  0xd7   :  { %574 = vmatpush.msrb.mxu0 %v336_v7  ;;  %594 = vmatpush.msrb.mxu1 %v337_v8  ;;  %v644_v5 = vld [vmem:[#allocation2 + $0x208] sm:$0xff]  ;;  %v679_v7 = vld [vmem:[#allocation2 + $0x320] sm:$0xff] }
  0xd8   :  { %614 = vmatpush.msrb.mxu2 %v338_v9  ;;  %634 = vmatpush.msrb.mxu3 %v339_v10  ;;  %v660_v6 = vld [vmem:[#allocation2 + $0x288] sm:$0xff]  ;;  %v695_v8 = vld [vmem:[#allocation2 + $0x3a0] sm:$0xff]  ;;  %v678_v9 = vld [vmem:[#allocation2 + $0x318] sm:$0xff] }
  0xd9   :  { %575 = vmatpush.msrb.mxu0 %v332_v11  ;;  %595 = vmatpush.msrb.mxu1 %v333_v12  ;;  %v694_v10 = vld [vmem:[#allocation2 + $0x398] sm:$0xff]  ;;  %v677_v11 = vld [vmem:[#allocation2 + $0x310] sm:$0xff] }
  0xda   :  { %615 = vmatpush.msrb.mxu2 %v334_v13  ;;  %635 = vmatpush.msrb.mxu3 %v335_v15  ;;  %v693_v12 = vld [vmem:[#allocation2 + $0x390] sm:$0xff]  ;;  %v676_v13 = vld [vmem:[#allocation2 + $0x308] sm:$0xff] }
  0xdb   :  { %576 = vmatmul.f32.vlgmr.msrb.gmra.mxu0 %v932_v14  ;;  %596 = vmatmul.f32.vlgmr.msrb.gmra.mxu1 %v932_v14  ;;  %v692_v15 = vld [vmem:[#allocation2 + $0x388] sm:$0xff] }
  0xdc   :  { %616 = vmatmul.f32.vlgmr.msrb.gmra.mxu2 %v932_v14  ;;  %636 = vmatmul.f32.vlgmr.msrb.gmra.mxu3 %v932_v14  ;;  %v671_v14 = vld [vmem:[#allocation2 + $0x2e0] sm:$0xff] }
  0xdd   :  { %710 = vmatpush.msra.mxu0 %v659_v16  ;;  %730 = vmatpush.msra.mxu1 %v675_v17  ;;  %v806_v16 = vld [vmem:[#allocation2 + $0x488] sm:$0xff]  ;;  %v805_v17 = vld [vmem:[#allocation2 + $0x480] sm:$0xff] }
  0xde   :  { %750 = vmatpush.msra.mxu2 %v691_v24  ;;  %770 = vmatpush.msra.mxu3 %v707_v25 }
  0xdf   :  { %711 = vmatpush.msra.mxu0 %v658_v18  ;;  %731 = vmatpush.msra.mxu1 %v674_v19  ;;  %v804_v18 = vld [vmem:[#allocation2 + $0x478] sm:$0xff] }
  0xe0   :  { %751 = vmatpush.msra.mxu2 %v690_v27  ;;  %771 = vmatpush.msra.mxu3 %v706_v28 }
  0xe1   :  { %712 = vmatpush.msra.mxu0 %v657_v20  ;;  %732 = vmatpush.msra.mxu1 %v673_v21  ;;  %v803_v21 = vld [vmem:[#allocation2 + $0x470] sm:$0xff] }
  0xe2   :  { %752 = vmatpush.msra.mxu2 %v689_v31  ;;  %772 = vmatpush.msra.mxu3 %v705_v32 }
  0xe3   :  { %713 = vmatpush.msra.mxu0 %v656_v22  ;;  %733 = vmatpush.msra.mxu1 %v672_v23  ;;  %v802_v22 = vld [vmem:[#allocation2 + $0x468] sm:$0xff]  ;;  %v801_v23 = vld [vmem:[#allocation2 + $0x460] sm:$0xff] }
  0xe4   :  { %753 = vmatpush.msra.mxu2 %v688_v35  ;;  %773 = vmatpush.msra.mxu3 %v704_v36 }
  0xe5   :  { %714 = vmatpush.msra.mxu0 %v655_v26  ;;  %734 = vmatpush.msra.mxu1 %v671_v14 }
  0xe6   :  { %754 = vmatpush.msra.mxu2 %v687_v39  ;;  %774 = vmatpush.msra.mxu3 %v703_v40 }
  0xe7   :  { %715 = vmatpush.msra.mxu0 %v654_v29  ;;  %735 = vmatpush.msra.mxu1 %v670_v30 }
  0xe8   :  { %755 = vmatpush.msra.mxu2 %v686_v43  ;;  %775 = vmatpush.msra.mxu3 %v702_v44  ;;  %v798_v43 = vld [vmem:[#allocation2 + $0x448] sm:$0xff]  ;;  %v797_v44 = vld [vmem:[#allocation2 + $0x440] sm:$0xff] }
  0xe9   :  { %716 = vmatpush.msra.mxu0 %v653_v33  ;;  %736 = vmatpush.msra.mxu1 %v669_v34 }
  0xea   :  { %756 = vmatpush.msra.mxu2 %v685_v47  ;;  %776 = vmatpush.msra.mxu3 %v701_v48  ;;  %v794_v47 = vld [vmem:[#allocation2 + $0x428] sm:$0xff]  ;;  %v793_v48 = vld [vmem:[#allocation2 + $0x420] sm:$0xff] }
  0xeb   :  { %717 = vmatpush.msra.mxu0 %v652_v37  ;;  %737 = vmatpush.msra.mxu1 %v668_v38 }
  0xec   :  { %757 = vmatpush.msra.mxu2 %v684_v51  ;;  %777 = vmatpush.msra.mxu3 %v700_v52  ;;  %v843_v51 = vld [vmem:[#allocation2 + $0x408] ss:$0 sm:$0xff] }
  0xed   :  { %718 = vmatpush.msra.mxu0 %v651_v41  ;;  %738 = vmatpush.msra.mxu1 %v667_v42  ;;  %v800_v41 = vld [vmem:[#allocation2 + $0x458] sm:$0xff]  ;;  %v799_v42 = vld [vmem:[#allocation2 + $0x450] sm:$0xff] }
  0xee   :  { %758 = vmatpush.msra.mxu2 %v683_v55  ;;  %778 = vmatpush.msra.mxu3 %v699_v56 }
  0xef   :  { %719 = vmatpush.msra.mxu0 %v650_v45  ;;  %739 = vmatpush.msra.mxu1 %v666_v46  ;;  %v796_v45 = vld [vmem:[#allocation2 + $0x438] sm:$0xff]  ;;  %v795_v46 = vld [vmem:[#allocation2 + $0x430] sm:$0xff] }
  0xf0   :  { %759 = vmatpush.msra.mxu2 %v682_v59  ;;  %779 = vmatpush.msra.mxu3 %v698_v60 }
  0xf1   :  { %720 = vmatpush.msra.mxu0 %v649_v49  ;;  %740 = vmatpush.msra.mxu1 %v665_v50  ;;  %v792_v49 = vld [vmem:[#allocation2 + $0x418] sm:$0xff]  ;;  %v791_v50 = vld [vmem:[#allocation2 + $0x410] sm:$0xff] }
  0xf2   :  { %760 = vmatpush.msra.mxu2 %v681_v63  ;;  %780 = vmatpush.msra.mxu3 %v697_v0 }
  0xf3   :  { %721 = vmatpush.msra.mxu0 %v648_v53  ;;  %741 = vmatpush.msra.mxu1 %v664_v54 }
  0xf4   :  { %761 = vmatpush.msra.mxu2 %v680_v3  ;;  %781 = vmatpush.msra.mxu3 %v696_v4 }
  0xf5   :  { %722 = vmatpush.msra.mxu0 %v647_v57  ;;  %742 = vmatpush.msra.mxu1 %v663_v58 }
  0xf6   :  { %762 = vmatpush.msra.mxu2 %v679_v7  ;;  %782 = vmatpush.msra.mxu3 %v695_v8 }
  0xf7   :  { %723 = vmatpush.msra.mxu0 %v646_v61  ;;  %743 = vmatpush.msra.mxu1 %v662_v62  ;;  %v844_v61 = vld [vmem:[#allocation2 + $0x490] ss:$0 sm:$0xff] }
  0xf8   :  { %763 = vmatpush.msra.mxu2 %v678_v9  ;;  %783 = vmatpush.msra.mxu3 %v694_v10 }
  0xf9   :  { %724 = vmatpush.msra.mxu0 %v645_v1  ;;  %744 = vmatpush.msra.mxu1 %v661_v2 }
  0xfa   :  { %764 = vmatpush.msra.mxu2 %v677_v11  ;;  %784 = vmatpush.msra.mxu3 %v693_v12 }
  0xfb   :  { %725 = vmatpush.msra.mxu0 %v644_v5  ;;  %745 = vmatpush.msra.mxu1 %v660_v6 }
  0xfc   :  { %765 = vmatpush.msra.mxu2 %v676_v13  ;;  %785 = vmatpush.msra.mxu3 %v692_v15 }
  0xfd   :  { %809 = vmatpush.msrb.mxu0 %v806_v16 }
  0xff   :  { %810 = vmatpush.msrb.mxu0 %v805_v17 }
 0x101   :  { %811 = vmatpush.msrb.mxu0 %v804_v18 }
 0x103   :  { %812 = vmatpush.msrb.mxu0 %v803_v21 }
 0x105   :  { %813 = vmatpush.msrb.mxu0 %v802_v22 }
 0x107   :  { %814 = vmatpush.msrb.mxu0 %v801_v23 }
 0x109   :  { %815 = vmatpush.msrb.mxu0 %v800_v41 }
 0x10b   :  { %816 = vmatpush.msrb.mxu0 %v799_v42 }
 0x10d   :  { %817 = vmatpush.msrb.mxu0 %v798_v43 }
 0x10f   :  { %818 = vmatpush.msrb.mxu0 %v797_v44 }
 0x111   :  { %819 = vmatpush.msrb.mxu0 %v796_v45 }
 0x113   :  { %820 = vmatpush.msrb.mxu0 %v795_v46 }
 0x115   :  { %821 = vmatpush.msrb.mxu0 %v794_v47 }
 0x117   :  { %822 = vmatpush.msrb.mxu0 %v793_v48 }
 0x119   :  { %823 = vmatpush.msrb.mxu0 %v792_v49 }
 0x11b   :  { %824 = vmatpush.msrb.mxu0 %v791_v50 }
 0x134   :  { %v413_v19 = vpop.f32.mrf.mxu0  ;;  %v433_v20 = vpop.f32.mrf.mxu1 }
 0x13b   :  { %v453_v24 = vpop.f32.mrf.mxu2  ;;  %v473_v25 = vpop.f32.mrf.mxu3 }
 0x13e   :  { %v493_v26 = vpop.f32.mrf.mxu0  ;;  %v513_v14 = vpop.f32.mrf.mxu1 }
 0x13f   :  { %v556_v27 = vmul.f32 %v493_v26, %v413_v19  ;;  %v557_v28 = vmul.f32 %v513_v14, %v433_v20 }
 0x145   :  { %v533_v29 = vpop.f32.mrf.mxu2  ;;  %v553_v30 = vpop.f32.mrf.mxu3 }
 0x146   :  { %v558_v35 = vmul.f32 %v533_v29, %v453_v24  ;;  %v559_v36 = vmul.f32 %v553_v30, %v473_v25 }
 0x158   :  { %v577_v31 = vpop.f32.mrf.mxu0  ;;  %v597_v32 = vpop.f32.mrf.mxu1 }
 0x159   :  { %v640_v33 = vmul.f32 %v577_v31, %v556_v27  ;;  %v641_v34 = vmul.f32 %v597_v32, %v557_v28 }
 0x15b   :  { %726 = vmatmul.f32.vlgmr.msra.gmra.mxu0 %v640_v33  ;;  %746 = vmatmul.f32.vlgmr.msra.gmra.mxu1 %v641_v34 }
 0x15f   :  { %v617_v37 = vpop.f32.mrf.mxu2  ;;  %v637_v38 = vpop.f32.mrf.mxu3 }
 0x160   :  { %v642_v39 = vmul.f32 %v617_v37, %v558_v35  ;;  %v643_v40 = vmul.f32 %v637_v38, %v559_v36 }
 0x162   :  { %766 = vmatmul.f32.vlgmr.msra.gmra.mxu2 %v642_v39  ;;  %786 = vmatmul.f32.vlgmr.msra.gmra.mxu3 %v643_v40 }
 0x1d8   :  { %v727_v52 = vpop.f32.mrf.mxu0  ;;  %v747_v54 = vpop.f32.mrf.mxu1 }
 0x1d9   :  { %v728_v53 = vadd.f32 %v843_v51, %v727_v52 }
 0x1db   :  { %v748_v55 = vadd.f32 %v747_v54, %v728_v53 }
 0x1e5   :  { %v767_v56 = vpop.f32.mrf.mxu2  ;;  %v787_v58 = vpop.f32.mrf.mxu3 }
 0x1e6   :  { %v768_v57 = vadd.f32 %v767_v56, %v748_v55 }
 0x1e8   :  { %v788_v59 = vadd.f32 %v787_v58, %v768_v57 }
 0x1ea   :  { %v790_v60 = vmax.f32 %v788_v59, 0.0 }
 0x1ec   :  { %825 = vmatmul.f32.vlgmr.msrb.gmra.mxu0 %v790_v60 }
 0x269   :  { %v826_v62 = vpop.f32.mrf.mxu0 }
 0x26a   :  { %v827_v63 = vadd.f32 %v844_v61, %v826_v62 }
 0x26c   :  { %829 = vst [vmem:[%s952_s3] sm:$0x3] %v827_v63 }
 0x26d   :  { %834 = vsyncpa [#allocation3], 1 }
 0x26e   :  { %835 = vsyncpa [#allocation5], 1 }

</bundles_post_ra>
